<compile_context>
chip_gen: v7x
topology: tpu7x:2x2x1
jax: 0.10.0
libtpu: 0.0.40
codegen_flags: <defaults>
</compile_context>

<pallas_src>
import functools

import jax
import jax.numpy as jnp
from jax.experimental import pallas as pl
from jax.experimental.pallas import tpu as pltpu


def _round_up(x: int, m: int) -> int:
    return ((x + m - 1) // m) * m


# ----------------------------------------------------------------------------
# Kernel: one (TB, TV) tile of the output logits.
#   mean_ref : (TB, D)  bf16  -- one batch tile of mean-pooled embeddings
#   w_ref    : (D, TV)  bf16  -- streamed weight tile (double-buffered)
#   b_ref    : (1, TV)  f32   -- matching bias tile
#   o_ref    : (TB, TV) f32 or bf16
# ----------------------------------------------------------------------------
def cbow_matmul_kernel(mean_ref, w_ref, b_ref, o_ref):
    acc = jnp.dot(mean_ref[...], w_ref[...], preferred_element_type=jnp.float32)
    o_ref[...] = (acc + b_ref[...]).astype(o_ref.dtype)


# ----------------------------------------------------------------------------
# Vocab-tile selection: largest multiple of 128 (capped) whose double-buffered
# working set fits the VMEM budget.  Worst-case batch tile (TB=256) assumed.
# ----------------------------------------------------------------------------
def _pick_vocab_tile(V, D, *, tv_cap, vmem_budget_bytes, out_bytes, tb_cap=256):
    v_full = _round_up(V, 128)
    tv = min(_round_up(tv_cap, 128), v_full)

    def working_set(tv_):
        return (2 * D * tv_ * 2            # bf16 weight tile, double-buffered
                + 2 * tv_ * 4              # f32 bias tile
                + 2 * tb_cap * tv_ * out_bytes   # output tile
                + 2 * tb_cap * D * 2)      # bf16 activation tile

    while tv > 128 and working_set(tv) > vmem_budget_bytes:
        tv -= 128
    return tv


# ----------------------------------------------------------------------------
# One-time parameter preparation (amortized outside the forward path):
# transpose Linear weight to (D, V), cast to bf16, pad V to a multiple of the
# vocab tile, reshape bias to (1, V_pad) f32.
#
# vocab_tile is a CAP on the tile size; the actual tile is chosen to fit the
# VMEM budget.  On v7x consider vocab_tile=16384; v5e/v6e default 8192.
# ----------------------------------------------------------------------------
def prepare_params(embedding_table, linear_weight, linear_bias, *,
                   vocab_tile=8192, out_dtype="float32",
                   vmem_budget_bytes=24 << 20):
    V, D = embedding_table.shape
    assert linear_weight.shape == (V, D)
    assert linear_bias.shape == (V,)

    out_bytes = jnp.dtype(out_dtype).itemsize
    TV = _pick_vocab_tile(V, D, tv_cap=vocab_tile,
                          vmem_budget_bytes=vmem_budget_bytes,
                          out_bytes=out_bytes)
    V_pad = _round_up(V, TV)

    w_t = jnp.transpose(linear_weight).astype(jnp.bfloat16)        # (D, V)
    bias = linear_bias.astype(jnp.float32)
    if V_pad != V:
        w_t = jnp.pad(w_t, ((0, 0), (0, V_pad - V)))
        bias = jnp.pad(bias, (0, V_pad - V))
    bias2d = bias.reshape(1, V_pad)

    return {
        "embedding_table": embedding_table.astype(jnp.float32),    # (V, D)
        "w_t": w_t,                                                # (D, V_pad) bf16
        "bias2d": bias2d,                                          # (1, V_pad) f32
        "vocab_size": V,
        "vocab_tile": TV,
        "out_dtype": out_dtype,
    }


# ----------------------------------------------------------------------------
# Eager-only index validation mirroring the PyTorch ValueError path.
# Must NOT be called under jax.jit (it host-syncs on purpose).
# TODO(synk): provide an in-jit variant via jax.experimental.checkify.
# ----------------------------------------------------------------------------
def validate_context_indices(context, vocab_size):
    if bool(jnp.any(context >= vocab_size)) or bool(jnp.any(context < 0)):
        raise ValueError(f"Invalid context indices: {context}")


# ----------------------------------------------------------------------------
# Forward factory, memoized so repeated calls reuse the same jitted callable.
# ----------------------------------------------------------------------------
@functools.lru_cache(maxsize=None)
def make_cbow_forward(vocab_size: int, vocab_tile: int, out_dtype: str = "float32"):
    V = vocab_size
    TV = vocab_tile
    out_dt = jnp.dtype(out_dtype)
    out_bytes = out_dt.itemsize

    @jax.jit
    def forward(context, embedding_table, w_t, bias2d):
        B, C = context.shape
        D = embedding_table.shape[1]
        V_pad = w_t.shape[1]
        assert V_pad % TV == 0

        # Glue: gather + mean as sum * (1/C), computed once, cast to bf16.
        gathered = jnp.take(embedding_table, context, axis=0, mode="clip")
        mean = (gathered.sum(axis=1) * (1.0 / C)).astype(jnp.bfloat16)  # (B, D)

        # Pad batch to a multiple of 16 (bf16 sublane packing).  For large B,
        # tile the batch axis at 256 (fills the 256-wide MXU on v6e/v7x;
        # v5e's 128-wide MXU is already full at 128 rows).
        B_pad = _round_up(max(B, 16), 16)
        if B_pad <= 256:
            TB = B_pad
        else:
            TB = 256
            B_pad = _round_up(B_pad, TB)
        if B_pad != B:
            mean = jnp.pad(mean, ((0, B_pad - B), (0, 0)))

        n_b = B_pad // TB
        n_v = V_pad // TV
        grid = (n_b, n_v)   # vocab axis innermost; weight index_map ignores i

        # Double-buffered working set -> explicit scoped-VMEM limit.
        # (Raises v5e's 16 MiB default; well inside v7x's 64 MiB total.)
        working_set = (2 * D * TV * 2 + 2 * TV * 4
                       + 2 * TB * TV * out_bytes + 2 * TB * D * 2)
        vmem_limit = int(min(max(working_set + (8 << 20), 32 << 20), 56 << 20))

        cost = pl.CostEstimate(
            flops=2 * B_pad * D * V_pad,
            transcendentals=0,
            bytes_accessed=(n_b * D * V_pad * 2      # bf16 weight stream (per batch tile)
                            + B_pad * D * 2          # bf16 activations
                            + n_b * V_pad * 4        # f32 bias
                            + B_pad * V_pad * out_bytes),  # logits writeback
        )

        out = pl.pallas_call(
            cbow_matmul_kernel,
            out_shape=jax.ShapeDtypeStruct((B_pad, V_pad), out_dt),
            grid=grid,
            in_specs=[
                # Activations: one batch tile, resident across the vocab axis.
                pl.BlockSpec((TB, D), lambda i, j: (i, 0)),
                # Weight: stream one (D, TV) tile per vocab step (batch-indep).
                pl.BlockSpec((D, TV), lambda i, j: (0, j)),
                # Bias: matching (1, TV) tile.
                pl.BlockSpec((1, TV), lambda i, j: (0, j)),
            ],
            out_specs=pl.BlockSpec((TB, TV), lambda i, j: (i, j)),
            compiler_params=pltpu.CompilerParams(
                dimension_semantics=("parallel", "parallel"),
                vmem_limit_bytes=vmem_limit,
            ),
            cost_estimate=cost,
        )(mean, w_t, bias2d)

        # Only slice when padding actually happened (avoids a second copy of
        # the logits in the common V % 128 == 0, B % 16 == 0 case).
        if B_pad != B or V_pad != V:
            out = out[:B, :V]
        return out

    return forward


def word2vec_cbow_forward(context, params, *, validate=False):
    """Convenience wrapper mirroring Word2VecCBOW.forward."""
    if validate:  # eager-only path, mirrors the PyTorch ValueError
        validate_context_indices(context, params["vocab_size"])
    fwd = make_cbow_forward(params["vocab_size"], params["vocab_tile"],
                            params["out_dtype"])
    return fwd(context, params["embedding_table"], params["w_t"],
               params["bias2d"])


if __name__ == "__main__":
    # Small, kernel-friendly shapes consistent with the module.
    vocab_size = 256
    embedding_dim = 128
    batch = 8
    context_len = 4

    key = jax.random.PRNGKey(0)
    k_emb, k_w, k_b, k_ctx = jax.random.split(key, 4)

    # Deterministic synthetic parameters (mimic nn.Embedding normal init and
    # nn.Linear uniform init).
    embedding_table = jax.random.normal(
        k_emb, (vocab_size, embedding_dim), dtype=jnp.float32)
    bound = 1.0 / (embedding_dim ** 0.5)
    linear_weight = jax.random.uniform(
        k_w, (vocab_size, embedding_dim), dtype=jnp.float32,
        minval=-bound, maxval=bound)
    linear_bias = jax.random.uniform(
        k_b, (vocab_size,), dtype=jnp.float32, minval=-bound, maxval=bound)

    context = jax.random.randint(
        k_ctx, (batch, context_len), minval=0, maxval=vocab_size,
        dtype=jnp.int32)

    # One-time parameter prep (transpose + bf16 cast + padding + tile choice).
    params = prepare_params(embedding_table, linear_weight, linear_bias)

    # Call twice: second call must reuse the memoized jitted forward.
    out = word2vec_cbow_forward(context, params, validate=True)
    out = word2vec_cbow_forward(context, params, validate=True)
    out = jax.block_until_ready(out)
    assert out.shape == (batch, vocab_size)
    assert out.dtype == jnp.float32

    # Reference 1: exact same numeric path in plain JAX (bf16 operands,
    # f32 accumulate) -- tight tolerance.
    mean_f32 = jnp.take(embedding_table, context, axis=0).mean(axis=1)
    mean_bf16 = mean_f32.astype(jnp.bfloat16)
    w_bf16 = linear_weight.T.astype(jnp.bfloat16)
    ref_bf16 = jnp.dot(mean_bf16, w_bf16,
                       preferred_element_type=jnp.float32) + linear_bias
    assert jnp.allclose(out, ref_bf16, atol=1e-3, rtol=1e-3), (
        float(jnp.max(jnp.abs(out - ref_bf16))))

    # Reference 2: full-f32 PyTorch-equivalent math -- loose tolerance
    # (bf16 weight/activation quantization, an explicit documented choice).
    ref_f32 = mean_f32 @ linear_weight.T + linear_bias
    assert jnp.allclose(out, ref_f32, atol=3e-2, rtol=3e-2), (
        float(jnp.max(jnp.abs(out - ref_f32))))

    print("KERNEL_OK")
</pallas_src>

<mosaic_0001>
module attributes {stable_mosaic.version = 11 : i64} {
  func.func @cbow_matmul_kernel(%arg0: i32, %arg1: i32, %arg2: memref<16x128xbf16, #tpu.memory_space<vmem>>, %arg3: memref<128x256xbf16, #tpu.memory_space<vmem>>, %arg4: memref<1x256xf32, #tpu.memory_space<vmem>>, %arg5: memref<16x256xf32, #tpu.memory_space<vmem>>) attributes {dimension_semantics = [#tpu.dimension_semantics<parallel>, #tpu.dimension_semantics<parallel>], iteration_bounds = array<i64: 1, 1>, scalar_prefetch = 0 : i64, scratch_operands = 0 : i64, tpu.core_type = #tpu.core_type<tc>, window_params = [{transform_indices = @transform_0, window_bounds = array<i64: 16, 128>}, {transform_indices = @transform_1, window_bounds = array<i64: 128, 256>}, {transform_indices = @transform_2, window_bounds = array<i64: 1, 256>}, {transform_indices = @transform_3, window_bounds = array<i64: 16, 256>}]} {
    %c0 = arith.constant 0 : index
    %c0_0 = arith.constant 0 : index
    %0 = vector.load %arg2[%c0, %c0_0] : memref<16x128xbf16, #tpu.memory_space<vmem>>, vector<16x128xbf16>
    %c0_1 = arith.constant 0 : index
    %c0_2 = arith.constant 0 : index
    %1 = vector.load %arg3[%c0_1, %c0_2] : memref<128x256xbf16, #tpu.memory_space<vmem>>, vector<128x256xbf16>
    %cst = arith.constant dense<0.000000e+00> : vector<16x256xf32>
    %2 = tpu.matmul %0, %1, %cst {dimension_numbers = #tpu.dot_dimension_numbers<[1], [0], [0], [1], [0, 0, 1, 1], [], []>} : vector<16x128xbf16>, vector<128x256xbf16>, vector<16x256xf32> -> vector<16x256xf32>
    %c0_3 = arith.constant 0 : index
    %c0_4 = arith.constant 0 : index
    %3 = vector.load %arg4[%c0_3, %c0_4] : memref<1x256xf32, #tpu.memory_space<vmem>>, vector<1x256xf32>
    %4 = vector.broadcast %3 : vector<1x256xf32> to vector<16x256xf32>
    %5 = arith.addf %2, %4 : vector<16x256xf32>
    %c0_5 = arith.constant 0 : index
    %c0_6 = arith.constant 0 : index
    %6 = vector.load %arg5[%c0_5, %c0_6] : memref<16x256xf32, #tpu.memory_space<vmem>>, vector<16x256xf32>
    tpu.vector_store %arg5[%c0_5, %c0_6], %5 {strides = array<i32>} : memref<16x256xf32, #tpu.memory_space<vmem>>, vector<16x256xf32>,
    return
  }
  func.func @transform_0(%arg0: i32, %arg1: i32) -> (i32, i32) {
    %c0_i32 = arith.constant 0 : i32
    %c0_i32_0 = arith.constant 0 : i32
    return %arg0, %c0_i32 : i32, i32
  }
  func.func @transform_1(%arg0: i32, %arg1: i32) -> (i32, i32) {
    %c0_i32 = arith.constant 0 : i32
    %c0_i32_0 = arith.constant 0 : i32
    return %c0_i32, %arg1 : i32, i32
  }
  func.func @transform_2(%arg0: i32, %arg1: i32) -> (i32, i32) {
    %c0_i32 = arith.constant 0 : i32
    %c0_i32_0 = arith.constant 0 : i32
    return %c0_i32, %arg1 : i32, i32
  }
  func.func @transform_3(%arg0: i32, %arg1: i32) -> (i32, i32) {
    %c0_i32 = arith.constant 0 : i32
    return %arg0, %arg1 : i32, i32
  }
}

</mosaic_0001>

<bundles_post_ra>
// kernel: forward.1
= control target key start
LH: loop header
LB: loop body
LE: loop exit
PB: predicated region body
PF: predicated region fallthrough
CT: control target
= control target key end

     0   :  { %v225_v1 = vmov 0   ;;  %v35_v18 = vlaneseq  ;;  %s312_s1 = inlined_call_operand.vmem [shape: bf16[128,256], index: 1, kind: input, shape index: {}]   ;;  %s313_s0 = inlined_call_operand.vmem [shape: bf16[16,128], index: 0, kind: input, shape index: {}]   ;;  %s314_s2 = inlined_call_operand.vmem [shape: f32[1,256], index: 2, kind: input, shape index: {}]   ;;  %s315_s3 = inlined_call_operand.vmem [shape: f32[16,256], index: 3, kind: output, shape index: {}]  }
   0x1   :  { %v200_v0 = vld [vmem:[%s312_s1 + $0x4] ss:$8 sps:$4 sm:$0xff]   ;;  %163 = vmatprep.mubr.bf16.mxu0 %v225_v1  ;;  %v202_v2 = vld [vmem:[%s312_s1] ss:$8 sps:$4 sm:$0xff]   ;;  %v203_v3 = vld [vmem:[%s312_s1 + $0x14] ss:$8 sps:$4 sm:$0xff]  }
   0x2   :  { %131 = vmatprep.subr.bf16.mxu0 %v200_v0  ;;  %v205_v4 = vld [vmem:[%s312_s1 + $0x10] ss:$8 sps:$4 sm:$0xff]   ;;  %v206_v5 = vld [vmem:[%s312_s1 + $0x24] ss:$8 sps:$4 sm:$0xff]   ;;  %v208_v6 = vld [vmem:[%s312_s1 + $0x20] ss:$8 sps:$4 sm:$0xff]  }
   0x3   :  { %132 = vmatpush1.bf16.msra.mxu0 %v202_v2  ;;  %v209_v7 = vld [vmem:[%s312_s1 + $0x34] ss:$8 sps:$4 sm:$0xff]   ;;  %v211_v8 = vld [vmem:[%s312_s1 + $0x30] ss:$8 sps:$4 sm:$0xff]   ;;  %v212_v9 = vld [vmem:[%s312_s1 + $0x44] ss:$8 sps:$4 sm:$0xff]  }
   0x4   :  { %133 = vmatprep.subr.bf16.mxu0 %v203_v3  ;;  %v214_v10 = vld [vmem:[%s312_s1 + $0x40] ss:$8 sps:$4 sm:$0xff]   ;;  %v215_v11 = vld [vmem:[%s312_s1 + $0x54] ss:$8 sps:$4 sm:$0xff]   ;;  %v217_v12 = vld [vmem:[%s312_s1 + $0x50] ss:$8 sps:$4 sm:$0xff]  }
   0x5   :  { %v218_v13 = vld [vmem:[%s312_s1 + $0x64] ss:$8 sps:$4 sm:$0xff]   ;;  %v220_v14 = vld [vmem:[%s312_s1 + $0x60] ss:$8 sps:$4 sm:$0xff]   ;;  %v221_v15 = vld [vmem:[%s312_s1 + $0x74] ss:$8 sps:$4 sm:$0xff]  }
   0x6   :  { %v223_v16 = vld [vmem:[%s312_s1 + $0x70] ss:$8 sps:$4 sm:$0xff]   ;;  %v224_v17 = vld [vmem:[%s313_s0] sm:$0xff]   ;;  %v36_v19 = vshrl.u32 %v35_v18, 7 }
   0x7   :  { %134 = vmatpush1.bf16.msra.mxu0 %v205_v4  ;;  %v33_v21 = vld [vmem:[%s314_s2] sm:$0x3] }
   0x8   :  { %135 = vmatprep.subr.bf16.mxu0 %v206_v5  ;;  %v37_v20 = vsub.s32 0, %v36_v19  ;;  %v41_v22 = vsub.s32 1, %v36_v19 }
   0xa   :  { %v38_v23 = vrot.slane %v33_v21, %v37_v20  ;;  %v42_v24 = vrot.slane %v33_v21, %v41_v22 }
   0xb   :  { %136 = vmatpush1.bf16.msra.mxu0 %v208_v6 }
   0xc   :  { %137 = vmatprep.subr.bf16.mxu0 %v209_v7 }
   0xf   :  { %138 = vmatpush1.bf16.msra.mxu0 %v211_v8 }
  0x10   :  { %139 = vmatprep.subr.bf16.mxu0 %v212_v9 }
  0x13   :  { %140 = vmatpush1.bf16.msra.mxu0 %v214_v10 }
  0x14   :  { %141 = vmatprep.subr.bf16.mxu0 %v215_v11 }
  0x17   :  { %142 = vmatpush1.bf16.msra.mxu0 %v217_v12 }
  0x18   :  { %143 = vmatprep.subr.bf16.mxu0 %v218_v13 }
  0x1b   :  { %144 = vmatpush1.bf16.msra.mxu0 %v220_v14 }
  0x1c   :  { %145 = vmatprep.subr.bf16.mxu0 %v221_v15 }
  0x1f   :  { %146 = vmatpush1.bf16.msra.mxu0 %v223_v16 }
  0x22   :  { %164 = vmatmul.mubr.bf16.vlgmr.msra.gmra.mrb[0].mxu0 %v224_v17 }
  0xf5   :  { %v165_v25 = vpop.f32.mrb[0].mxu0 }
  0xf6   :  { %v166_v26 = vadd.f32 %v165_v25, %v38_v23  ;;  %v167_v27 = vpop.f32.mrb[1].mxu0 }
  0xf7   :  { %v168_v28 = vadd.f32 %v167_v27, %v42_v24  ;;  %v169_v29 = vpop.f32.mrb[2].mxu0 }
  0xf8   :  { %174 = vst [vmem:[%s315_s3] sm:$0xff] %v166_v26  ;;  %v170_v30 = vadd.f32 %v169_v29, %v38_v23  ;;  %v171_v31 = vpop.f32.mrb[3].mxu0 }
  0xf9   :  { %175 = vst [vmem:[%s315_s3 + $0x8] sm:$0xff] %v168_v28  ;;  %v172_v32 = vadd.f32 %v171_v31, %v42_v24 }
  0xfa   :  { %176 = vst [vmem:[%s315_s3 + $0x10] sm:$0xff] %v170_v30 }
  0xfb   :  { %177 = vst [vmem:[%s315_s3 + $0x18] sm:$0xff] %v172_v32 }

</bundles_post_ra>
